<compile_context>
chip_gen: v6e
topology: v6e:2x2x1
jax: 0.10.0
libtpu: 0.0.40
codegen_flags: <defaults>
</compile_context>

<pallas_src>
import jax
import jax.numpy as jnp
from jax.experimental import pallas as pl
from jax.experimental.pallas import tpu as pltpu


# --------------------------------- helpers -----------------------------------
def _round_up(n, m):
    return ((n + m - 1) // m) * m


def _pick_tf(f_pad):
    for c in (512, 384, 256, 128):
        if f_pad % c == 0:
            return c
    return f_pad


def _vmem_budget_bytes():
    # Capacity minus headroom for compiler internal scratch / semaphores.
    # v5e/v6e: 128 MiB -> 112 MiB budget; v7x: 64 MiB -> 48 MiB budget.
    cap = 64 * 2 ** 20  # conservative fallback (v7x per-TensorCore)
    try:
        info = pltpu.get_tpu_info()
        c = getattr(info, "vmem_capacity_bytes", None)
        if c:
            cap = int(c)
    except Exception:
        pass
    return max(cap - 16 * 2 ** 20, 32 * 2 ** 20)


def _step_vmem_bytes(tt, tf, H, out_bytes):
    per_buf = (tt * H * 2            # x tile (bf16)
               + H * (2 * tf) * 2    # fused w13 tile (bf16)
               + tf * H * 2          # w2 tile (bf16)
               + tt * 4              # combine column (f32)
               + tt * H * out_bytes) # output block
    return 2 * per_buf + tt * H * 4  # double-buffered streams + f32 acc scratch


def _pick_tt(T, H, tf, out_bytes, budget):
    cands = (1024, 512, 256, 128, 64, 32, 16, 8)
    fitting = [c for c in cands if _step_vmem_bytes(c, tf, H, out_bytes) <= budget]
    if not fitting:
        fitting = [8]
    for tt in fitting:                     # descending: biggest tile that fits ...
        if pl.cdiv(T, tt) >= 2:            # ... while keeping >=2 token tiles (v7x megacore)
            return tt
    return fitting[-1]


# ------------------------- one-time weight preparation ------------------------
def prepare_moe_params(params):
    """Call ONCE at init/param-load time; result is reused by every forward."""
    gate_w = params["gate_w"]                      # [C, E, H]
    w1, w3, w2 = params["w1"], params["w3"], params["w2"]   # [E,F,H],[E,F,H],[E,H,F]
    E, F, H = w1.shape
    C = gate_w.shape[0]

    F_pad = _round_up(F, 128)                      # keeps all lane slices 128-aligned
    tf = _pick_tf(F_pad)
    nf = F_pad // tf

    # Gate weights: pre-transposed + lane-padded -> lane-dense router logits.
    e_pad = _round_up(max(E, 128), 128)
    gwt = jnp.zeros((C, H, e_pad), jnp.bfloat16)
    gwt = gwt.at[:, :, :E].set(jnp.transpose(gate_w, (0, 2, 1)).astype(jnp.bfloat16))

    def pad_rows(w):                               # [E, F, H] -> [E, F_pad, H]
        if F_pad == F:
            return w
        return jnp.zeros((E, F_pad, H), w.dtype).at[:, :F, :].set(w)

    # Fused w1/w3, interleaved per F-tile: columns [f*2tf : f*2tf+tf] = w1 tile f,
    # next tf columns = w3 tile f. Zero-padded F columns contribute exactly zero.
    w1t = jnp.transpose(pad_rows(w1), (0, 2, 1)).reshape(E, H, nf, 1, tf)
    w3t = jnp.transpose(pad_rows(w3), (0, 2, 1)).reshape(E, H, nf, 1, tf)
    w13 = jnp.concatenate([w1t, w3t], axis=3).reshape(E, H, 2 * F_pad).astype(jnp.bfloat16)

    if F_pad == F:
        w2p = w2
    else:
        w2p = jnp.zeros((E, H, F_pad), w2.dtype).at[:, :, :F].set(w2)
    w2t = jnp.transpose(w2p, (0, 2, 1)).astype(jnp.bfloat16)        # [E, F_pad, H]

    return {"gwt": gwt, "w13": w13, "w2t": w2t,
            "num_experts": E, "tf": tf, "F_pad": F_pad}


# ------------------------------- router kernel -------------------------------
def _router_kernel(x_ref, gwt_ref, o_ref):
    o_ref[...] = jnp.dot(x_ref[...], gwt_ref[...],
                         preferred_element_type=jnp.float32)


def router_logits(x_bf, gwt, *, tt, vmem_limit):
    T_pad, H = x_bf.shape
    e_pad = gwt.shape[1]
    tt = min(tt, T_pad)
    return pl.pallas_call(
        _router_kernel,
        out_shape=jax.ShapeDtypeStruct((T_pad, e_pad), jnp.float32),
        grid=(T_pad // tt,),
        in_specs=[pl.BlockSpec((tt, H), lambda i: (i, 0)),
                  pl.BlockSpec((H, e_pad), lambda i: (0, 0))],
        out_specs=pl.BlockSpec((tt, e_pad), lambda i: (i, 0)),
        compiler_params=pltpu.CompilerParams(
            dimension_semantics=("parallel",),
            vmem_limit_bytes=int(vmem_limit)),
    )(x_bf, gwt)


# ------------------------------- expert kernel --------------------------------
def _moe_kernel(ids_ref, nact_ref, x_ref, cw_ref, w13_ref, w2_ref, o_ref, acc_ref):
    i = pl.program_id(0)        # token tile
    f = pl.program_id(1)        # F tile
    e = pl.program_id(2)        # compacted expert slot (innermost -> DMA skip works)
    nf = pl.num_programs(1)
    ne = pl.num_programs(2)
    tf = w2_ref.shape[0]

    @pl.when(jnp.logical_and(f == 0, e == 0))
    def _init():
        acc_ref[...] = jnp.zeros_like(acc_ref)

    # Inactive slots repeat the previous expert id in the index_maps (no new weight
    # DMA) and are skipped here (no MXU work).
    @pl.when(e < nact_ref[i])
    def _compute():
        x = x_ref[...]                                              # [tt, H]   bf16
        h = jnp.dot(x, w13_ref[...],
                    preferred_element_type=jnp.float32)             # [tt, 2*tf] f32
        h1 = h[:, :tf]
        h3 = h[:, tf:]
        prod = h1 * h3
        act = prod * jax.nn.sigmoid(prod)                           # SiLU(f1*f3)
        # Fold the per-token combine weight in f32 BEFORE the bf16 cast
        # (cw*(act@w2) == (cw*act)@w2); multiply is [tt,tf] instead of [tt,H].
        act = (act * cw_ref[...]).astype(jnp.bfloat16)
        acc_ref[...] += jnp.dot(act, w2_ref[...],
                                preferred_element_type=jnp.float32)  # [tt, H] f32

    @pl.when(jnp.logical_and(f == nf - 1, e == ne - 1))
    def _fin():
        o_ref[...] = acc_ref[...].astype(o_ref.dtype)


def moe_experts(x_bf, combine_cols, ids, nact, w13, w2t, *,
                tt, tf, out_dtype, vmem_limit):
    T_pad, H = x_bf.shape
    E, F_pad, _ = w2t.shape
    nt, nf = T_pad // tt, F_pad // tf
    out_bytes = jnp.dtype(out_dtype).itemsize

    # Advisory cost: only top-2 of E experts actually compute per token.
    cost = pl.CostEstimate(
        flops=int(2 * T_pad * 2 * 3 * H * F_pad),
        transcendentals=int(T_pad * 2 * F_pad),
        bytes_accessed=int(nt * min(E, 2 * tt) * 3 * H * F_pad * 2
                           + T_pad * H * 2 + T_pad * H * out_bytes),
    )

    return pl.pallas_call(
        _moe_kernel,
        out_shape=jax.ShapeDtypeStruct((T_pad, H), out_dtype),
        grid_spec=pltpu.PrefetchScalarGridSpec(
            num_scalar_prefetch=2,                 # ids [nt,E], nact [nt] -> SMEM
            grid=(nt, nf, E),
            in_specs=[
                pl.BlockSpec((tt, H), lambda i, f, e, ids, nact: (i, 0)),       # x
                pl.BlockSpec((None, tt, 1),
                             lambda i, f, e, ids, nact: (ids[i, e], i, 0)),     # combine col
                pl.BlockSpec((None, H, 2 * tf),
                             lambda i, f, e, ids, nact: (ids[i, e], 0, f)),     # fused w1|w3
                pl.BlockSpec((None, tf, H),
                             lambda i, f, e, ids, nact: (ids[i, e], f, 0)),     # w2
            ],
            out_specs=pl.BlockSpec((tt, H), lambda i, f, e, ids, nact: (i, 0)),
            scratch_shapes=[pltpu.VMEM((tt, H), jnp.float32)],                  # f32 acc
        ),
        compiler_params=pltpu.CompilerParams(
            dimension_semantics=("parallel", "arbitrary", "arbitrary"),
            vmem_limit_bytes=int(vmem_limit)),
        cost_estimate=cost,
    )(ids, nact, x_bf, combine_cols, w13, w2t)


# ------------------------------ full MoE block --------------------------------
def moe_block_rs(hidden_states, prep, cluster_index_list):
    """prep = prepare_moe_params(params) computed once at init time."""
    B, S, H = hidden_states.shape
    T = B * S
    E = int(prep["num_experts"])
    tf = int(prep["tf"])
    out_dtype = hidden_states.dtype
    out_bytes = jnp.dtype(out_dtype).itemsize

    budget = _vmem_budget_bytes()
    tt = _pick_tt(T, H, tf, out_bytes, budget)
    T_pad = _round_up(T, tt)
    nt = T_pad // tt

    x = hidden_states.reshape(T, H).astype(jnp.bfloat16)
    x_pad = x if T_pad == T else jnp.zeros((T_pad, H), jnp.bfloat16).at[:T].set(x)

    # forward(): cluster_index_count == 0 -> gate index = cluster_index_list[-1]
    g = cluster_index_list[-1]
    gwt = prep["gwt"][g]                                            # [H, 128] bf16
    logits = router_logits(x_pad, gwt, tt=min(tt, 256),
                           vmem_limit=budget)[:T, :E]               # [T, E] f32

    probs = jax.nn.softmax(logits, axis=-1)
    top_vals, top_idx = jax.lax.top_k(probs, 2)
    top_vals = top_vals / jnp.sum(top_vals, axis=-1, keepdims=True)
    combine = jnp.zeros((T, E), jnp.float32).at[
        jnp.arange(T)[:, None], top_idx].add(top_vals)              # dense [T, E]
    if T_pad != T:
        combine = jnp.zeros((T_pad, E), jnp.float32).at[:T].set(combine)

    # Per-token-tile compacted active-expert table: first nact[i] entries of
    # ids[i] are the active experts; the tail repeats the last active expert so
    # the data-dependent index_maps re-use the already-fetched block (no DMA).
    active = (combine.reshape(nt, tt, E) != 0.0).any(axis=1)        # [nt, E]
    slot = jnp.arange(E, dtype=jnp.int32)[None, :]
    ids = jnp.argsort(jnp.where(active, slot, slot + E), axis=1).astype(jnp.int32)
    nact = active.sum(axis=1).astype(jnp.int32)                     # [nt]
    last = jnp.take_along_axis(ids, jnp.maximum(nact - 1, 0)[:, None], axis=1)
    ids = jnp.where(slot < nact[:, None], ids, last).astype(jnp.int32)

    combine_cols = jnp.transpose(combine)[:, :, None]               # [E, T_pad, 1] f32

    out_pad = moe_experts(x_pad, combine_cols, ids, nact,
                          prep["w13"], prep["w2t"],
                          tt=tt, tf=tf, out_dtype=out_dtype,
                          vmem_limit=budget)                        # [T_pad, H]
    return out_pad[:T].reshape(B, S, H)


# ------------------------------ pure-JAX reference ----------------------------
def moe_block_ref(hidden_states, params, cluster_index_list):
    # Mirrors the kernel math (bf16 MXU inputs, f32 accumulation, cw folded in f32).
    B, S, H = hidden_states.shape
    x = hidden_states.reshape(-1, H).astype(jnp.bfloat16)
    g = cluster_index_list[-1]
    gw = params["gate_w"][g].astype(jnp.bfloat16)
    logits = jnp.dot(x, gw.T, preferred_element_type=jnp.float32)
    probs = jax.nn.softmax(logits, axis=-1)
    top_vals, top_idx = jax.lax.top_k(probs, 2)
    top_vals = top_vals / jnp.sum(top_vals, axis=-1, keepdims=True)
    out = jnp.zeros((x.shape[0], H), jnp.float32)
    for e in range(params["w1"].shape[0]):
        w1 = params["w1"][e].astype(jnp.bfloat16)
        w3 = params["w3"][e].astype(jnp.bfloat16)
        w2 = params["w2"][e].astype(jnp.bfloat16)
        h1 = jnp.dot(x, w1.T, preferred_element_type=jnp.float32)
        h3 = jnp.dot(x, w3.T, preferred_element_type=jnp.float32)
        prod = h1 * h3
        act = prod * jax.nn.sigmoid(prod)
        w = jnp.sum(jnp.where(top_idx == e, top_vals, 0.0), axis=-1, keepdims=True)
        out = out + jnp.dot((act * w).astype(jnp.bfloat16), w2.T,
                            preferred_element_type=jnp.float32)
    return out.reshape(B, S, H).astype(hidden_states.dtype)


if __name__ == "__main__":
    # Small synthetic shapes consistent with the module's forward.
    B, S, H, F = 2, 8, 32, 64
    E, C = 12, 5
    cluster_index_list = [0, 1, 2, 3, 4]

    key = jax.random.PRNGKey(0)
    k0, k1, k2, k3, k4 = jax.random.split(key, 5)
    hidden_states = jax.random.normal(k0, (B, S, H), jnp.float32)
    params = {
        "gate_w": 0.1 * jax.random.normal(k1, (C, E, H), jnp.float32),
        "w1": 0.1 * jax.random.normal(k2, (E, F, H), jnp.float32),
        "w3": 0.1 * jax.random.normal(k3, (E, F, H), jnp.float32),
        "w2": 0.1 * jax.random.normal(k4, (E, H, F), jnp.float32),
    }

    # One-time (init / param-load time) weight preprocessing -- not per forward.
    prep = jax.tree_util.tree_map(jax.block_until_ready, prepare_moe_params(params))

    out = moe_block_rs(hidden_states, prep, cluster_index_list)
    out = jax.block_until_ready(out)

    ref = moe_block_ref(hidden_states, params, cluster_index_list)
    assert out.shape == (B, S, H)
    assert jnp.allclose(out, ref, atol=5e-3, rtol=5e-3), "mismatch vs reference"

    print("KERNEL_OK")
</pallas_src>

<mosaic_0001>
module attributes {stable_mosaic.version = 11 : i64} {
  func.func @_router_kernel(%arg0: i32, %arg1: memref<8x32xbf16, #tpu.memory_space<vmem>>, %arg2: memref<32x128xbf16, #tpu.memory_space<vmem>>, %arg3: memref<8x128xf32, #tpu.memory_space<vmem>>) attributes {dimension_semantics = [#tpu.dimension_semantics<parallel>], iteration_bounds = array<i64: 2>, scalar_prefetch = 0 : i64, scratch_operands = 0 : i64, tpu.core_type = #tpu.core_type<tc>, window_params = [{transform_indices = @transform_0, window_bounds = array<i64: 8, 32>}, {pipeline_mode = #tpu.pipeline_mode<synchronous>, transform_indices = @transform_1, window_bounds = array<i64: 32, 128>}, {transform_indices = @transform_2, window_bounds = array<i64: 8, 128>}]} {
    %c0 = arith.constant 0 : index
    %c0_0 = arith.constant 0 : index
    %0 = vector.load %arg1[%c0, %c0_0] : memref<8x32xbf16, #tpu.memory_space<vmem>>, vector<8x32xbf16>
    %c0_1 = arith.constant 0 : index
    %c0_2 = arith.constant 0 : index
    %1 = vector.load %arg2[%c0_1, %c0_2] : memref<32x128xbf16, #tpu.memory_space<vmem>>, vector<32x128xbf16>
    %cst = arith.constant dense<0.000000e+00> : vector<8x128xf32>
    %2 = tpu.matmul %0, %1, %cst {dimension_numbers = #tpu.dot_dimension_numbers<[1], [0], [0], [1], [0, 0, 1, 1], [], []>} : vector<8x32xbf16>, vector<32x128xbf16>, vector<8x128xf32> -> vector<8x128xf32>
    %c0_3 = arith.constant 0 : index
    %c0_4 = arith.constant 0 : index
    %3 = vector.load %arg3[%c0_3, %c0_4] : memref<8x128xf32, #tpu.memory_space<vmem>>, vector<8x128xf32>
    tpu.vector_store %arg3[%c0_3, %c0_4], %2 {strides = array<i32>} : memref<8x128xf32, #tpu.memory_space<vmem>>, vector<8x128xf32>,
    return
  }
  func.func @transform_0(%arg0: i32) -> (i32, i32) {
    %c0_i32 = arith.constant 0 : i32
    %c0_i32_0 = arith.constant 0 : i32
    return %arg0, %c0_i32 : i32, i32
  }
  func.func @transform_1(%arg0: i32) -> (i32, i32) {
    %c0_i32 = arith.constant 0 : i32
    %c0_i32_0 = arith.constant 0 : i32
    %c0_i32_1 = arith.constant 0 : i32
    return %c0_i32, %c0_i32_0 : i32, i32
  }
  func.func @transform_2(%arg0: i32) -> (i32, i32) {
    %c0_i32 = arith.constant 0 : i32
    %c0_i32_0 = arith.constant 0 : i32
    return %arg0, %c0_i32 : i32, i32
  }
}

</mosaic_0001>

<bundles_post_ra>
// kernel: tpu_custom_call.1
= control target key start
LH: loop header
LB: loop body
LE: loop exit
PB: predicated region body
PF: predicated region fallthrough
CT: control target
= control target key end

     0   :  { %7 = vsyncpa [#allocation3], 0  ;;  %s735_s0 = inlined_call_operand.hbm [shape: bf16[16,32], index: 0, kind: input, shape index: {}]   ;;  %s736_s1 = inlined_call_operand.hbm [shape: bf16[32,128], index: 1, kind: input, shape index: {}]   ;;  %s737_s2 = inlined_call_operand.hbm [shape: f32[16,128], index: 2, kind: output, shape index: {}]  }
   0x1   :  { %9 = vsyncpa [#allocation3 + $0x1], 0 }
   0x2   :  { %10 = vsyncpa [#allocation6], 0 }
   0x3   :  { %11 = vsyncpa [#allocation4], 0 }
   0x4   :  { %13 = vsyncpa [#allocation4 + $0x1], 0  ;;  %s568_s9 = smov 0   ;;  %s570_s10 = smov 0  }
   0x5   :  { %s572_s11 = smov 0   ;;  %s574_s12 = smov 0  }
   0x6 LB: > { %s589_s13 = sadd.s32 4294967295, %s544_s12   ;;  %s331_s14 = sadd.s32 4294967294, %s544_s12   ;;  %s544_s12 = sphi %s574_s12, %s759_s12   ;;  %s540_s11 = sphi %s572_s11, %s758_s11   ;;  %s536_s10 = sphi %s570_s10, %s757_s10   ;;  %s532_s9 = sphi %s568_s9, %s756_s9  }
   0x7   : > { %p39_p0 = scmp.ne.s32.totalorder %s536_s10, %s532_s9  ;;  %p738_p1 = scmp.eq.s32.totalorder %s589_s13, 0 }
   0x8   : > { %p90_p3 = scmp.eq.s32.totalorder %s331_s14, 1  ;;  %p332_p5 = scmp.ge.s32.totalorder %s544_s12, 1 }
   0x9   : > { %p598_p4 = por %p738_p1, %p39_p0  ;;  %p97_p7 = scmp.lt.s32.totalorder %s544_s12, 3 }
   0xa   : > { %p603_p6 = por %p90_p3, %p39_p0  ;;  %s546_s18 = smov [#allocation5]  }
   0xb   : > { %s742_s15 = scalar_select %p598_p4, 1, 0 }
   0xc   : > { %s743_s16 = scalar_select %p603_p6, 1, 0 }
   0xd   : > { %p608_p8 = pnand %p332_p5, %p97_p7  ;;  %s109_s19 = sshll.u32 %s546_s18, 4  ;;  %s110_s19 = int_to_ptr.vmem [resolvable:$true] %s109_s19 }
   0xe   : > { %s622_s21 = sadd.s32 1, %s544_s12   ;;  %s26_s22 = sadd.s32 1, %s540_s11 }
   0xf   : > { %s744_s17 = scalar_select %p608_p8, 1, 0 }
  0x10   : > { %p367_p9 = pneg %p608_p8  ;;  %s23_s23 = ssub.s32 %s544_s12, %s622_s21 }
  0x11   : > { %s433_s24 = scalar_lea.vmem %s110_s19, 256  ;;  %p441_p5 = scmp.lt.s32.totalorder %s110_s19, %s110_s19 }
  0x12   : > { %p617_p11 = pnand %p367_p9, %p738_p1  ;;  %p434_p13 = scmp.ne.s32.totalorder %s110_s19, %s433_s24 }
  0x13   : > { %p442_p7 = scmp.lt.s32.totalorder %s433_s24, %s433_s24 }
  0x14   : > { %p424_p12 = pneg %p617_p11 }
  0x15   : > { %p443_p10 = por %p442_p7, %p441_p5 }
  0x16   : > { %p436_p0 = pnand %p434_p13, %p424_p12 }
  0x18   : > { %p437_p3 = pneg %p436_p0 }
  0x1a   : > { %p444_p2 = pnand %p443_p10, %p437_p3 }
  0x1c   : > { %447 = shalt.err (!%p444_p2)
}
  0x1d   : > { %s547_s25 = smov 64   ;;  %s548_s26 = smov 4  }
  0x1e   : > { %370 = dma.hbm_to_vmem [thread:$0]  (!%p617_p11), %s736_s1, 256, %s110_s19, [#allocation6], %s547_s25, %s547_s25, %s548_s26  }
  0x1f   : > { %p24_p9 = scmp.eq.s32.totalorder %s23_s23, 0  ;;  %p33_p12 = scmp.ne.s32.totalorder %s540_s11, %s536_s10 }
  0x20   : > { %p34_p10 = scmp.eq.s32.totalorder %s544_s12, 0  ;;  %p380_p2 = scmp.lt.s32.totalorder %s544_s12, 2 }
  0x21   : > { %s639_s29 = scalar_select %p24_p9, %s540_s11, %s26_s22  }
  0x22   : > { %p35_p13 = por %p34_p10, %p33_p12  ;;  %p746_p0 = scmp.eq.s32.totalorder %s589_s13, 1 }
  0x23   : > { %s123_s3 = sand.u32 1, %s540_s11   ;;  %s336_s4 = sshll.u32 %s544_s12, 6 }
  0x24   : > { %p643_p3 = por %p746_p0, %p33_p12  ;;  %s335_s5 = sshll.u32 %s123_s3, 2 }
  0x25   : > { %s652_s8 = scalar_lea.hbm %s735_s0, %s336_s4  ;;  %s127_s14 = scalar_lea.vmem [#allocation2], %s335_s5 }
  0x26   : > { %s747_s30 = scalar_select %p643_p3, 1, 0 }
  0x27   : > { %s134_s18 = sshll.u32 %s127_s14, 4  ;;  %p654_p11 = pnand %p380_p2, %p35_p13  ;;  %s135_s18 = int_to_ptr.vmem [resolvable:$true] %s134_s18 }
  0x28   : > { %s124_s20 = scalar_lea.sflag [#allocation3], %s123_s3  ;;  %s448_s22 = scalar_lea.hbm %s652_s8, 64 }
  0x29   : > { %p449_p5 = scmp.ne.s32.totalorder %s652_s8, %s448_s22  ;;  %p450_p7 = pneg %p654_p11 }
  0x2a   : > { %s453_s25 = scalar_lea.hbm %s735_s0, 128  ;;  %p454_p10 = scmp.lt.s32.totalorder %s652_s8, %s735_s0 }
  0x2b   : > { %p451_p9 = pnand %p450_p7, %p449_p5  ;;  %p455_p2 = scmp.lt.s32.totalorder %s453_s25, %s448_s22 }
  0x2d   : > { %p452_p12 = pneg %p451_p9  ;;  %p456_p13 = por %p455_p2, %p454_p10 }
  0x2f   : > { %p457_p0 = pnand %p456_p13, %p452_p12 }
  0x31   : > { %460 = shalt.err (!%p457_p0)
}
  0x32   : > { %s461_s28 = scalar_lea.vmem %s135_s18, 64  ;;  %s549_s3 = smov [#allocation2]  }
  0x33   : > { %p462_p1 = scmp.ne.s32.totalorder %s135_s18, %s461_s28  ;;  %s466_s4 = sshll.u32 %s549_s3, 4  ;;  %s467_s4 = int_to_ptr.vmem [resolvable:$false] %s466_s4 }
  0x34   : > { %s468_s5 = scalar_lea.vmem %s467_s4, 128  ;;  %p469_p5 = scmp.lt.s32.totalorder %s135_s18, %s467_s4 }
  0x35   : > { %p464_p6 = pnand %p462_p1, %p450_p7  ;;  %p470_p9 = scmp.lt.s32.totalorder %s468_s5, %s461_s28 }
  0x37   : > { %p465_p3 = pneg %p464_p6  ;;  %p471_p4 = por %p470_p9, %p469_p5 }
  0x39   : > { %p472_p8 = pnand %p471_p4, %p465_p3 }
  0x3b   : > { %475 = shalt.err (!%p472_p8)
}
  0x3c   : > { %374 = dma.hbm_to_vmem [thread:$0]  (!%p654_p11), %s652_s8, 64, %s135_s18, %s124_s20  }
  0x3d   : > { %p749_p12 = scmp.ne.s32.totalorder %s744_s17, 0 }
  0x3e   : > { %s675_s6 = sand.u32 (!%p749_p12), 1, %s536_s10   ;;  %p750_p1 = scmp.ne.s32.totalorder (!%p749_p12), %s742_s15, 0 }
  0x3f   : > { %143 = sbr.rel (%p749_p12) target bundleno = 290 (0x122), region = 28  ;;  %s338_s7 = sshll.u32 (!%p749_p12), %s675_s6, 2 }
  0x40   : > { %s146_s14 = scalar_lea.sflag (!%p749_p12), [#allocation3], %s675_s6  ;;  %s149_s22 = scalar_lea.vmem (!%p749_p12), [#allocation2], %s338_s7 }
  0x44   : > { %519 = dma.done.wait (%p750_p1), %s146_s14, 64  }
  0x45   : > { %521 = vsyncadd (%p750_p1), %s146_s14, 4294967232  ;;  %p751_p4 = scmp.eq.s32.totalorder %s589_s13, 0 }
  0x47   : > { %523 = dma.done.wait (%p751_p4), [#allocation6], 256   ;;  %p752_p6 = pmov %p751_p4 }
  0x48   : > { %v550_v0 = vmov 0.0   ;;  %vm551_vm0 = vmmov 0   ;;  %v420_v1 = vld [vmem:[#allocation5 + $0x8] sm:$0xff]   ;;  %v421_v2 = vld [vmem:[#allocation5] sm:$0xff]   ;;  %v175_v3 = vld [vmem:[%s149_s22] sm:$0xf] }
  0x49   : > { %525 = vsyncadd (%p752_p6), [#allocation6], 4294967040  ;;  %351 = vmatprep.subr.bf16.mxu0 %v550_v0  ;;  %355 = vmatprep.mubr.msk.bf16.mxu0 %vm551_vm0, %v550_v0  ;;  %vm192_vm1 = vcmask 261120   ;;  %s340_s15 = sshll.u32 %s675_s6, 3  ;;  %s345_s18 = sshll.u32 %s589_s13, 7 }
  0x4a   : > { %352 = vmatpush3.bf16.msra.mxu0 %v420_v1  ;;  %s173_s17 = scalar_lea.vmem [#allocation7], %s340_s15  ;;  %s694_s23 = scalar_lea.hbm %s737_s2, %s345_s18 }
  0x4b   : > { %353 = vmatprep.subr.bf16.mxu0 %v550_v0  ;;  %s251_s8 = sshll.u32 %s173_s17, 4  ;;  %s238_s24 = scalar_lea.sflag [#allocation4], %s675_s6  ;;  %s689_s8 = int_to_ptr.vmem [resolvable:$true] %s251_s8 }
  0x4c   : > { %s476_s25 = scalar_lea.vmem %s689_s8, 128  ;;  %p753_p3 = scmp.ne.s32.totalorder %s747_s30, 0 }
  0x4d   : > { %p477_p8 = scmp.ne.s32.totalorder %s689_s8, %s476_s25  ;;  %s552_s13 = smov [#allocation7]  }
  0x4e   : > { %354 = vmatpush3.bf16.msra.mxu0 %v421_v2  ;;  %s480_s26 = sshll.u32 %s552_s13, 4  ;;  %s481_s26 = int_to_ptr.vmem [resolvable:$false] %s480_s26 }
  0x4f   : > { %p478_p11 = pnand %p477_p8, %p753_p3  ;;  %s482_s27 = scalar_lea.vmem %s481_s26, 256 }
  0x50   : > { %p483_p10 = scmp.lt.s32.totalorder %s689_s8, %s481_s26  ;;  %p484_p2 = scmp.lt.s32.totalorder %s482_s27, %s476_s25 }
  0x51   : > { %356 = vmatmul.mubr.msk.bf16.vlgmr.msra.gmra.mxu0 %vm192_vm1, %v175_v3  ;;  %p479_p7 = pneg %p478_p11 }
  0x52   : > { %p485_p13 = por %p484_p2, %p483_p10 }
  0x54   : > { %p486_p0 = pnand %p485_p13, %p479_p7 }
 0x111   : > { %v230_v4 = vpop.f32.mrf.mxu0 }
 0x112   : > { %236 = vst [vmem:[%s173_s17] sm:$0xff] %v230_v4 }
 0x113   : > { %v357_v5 = vpop.f32.mrf.mxu0 }
 0x114   : > { %489 = shalt.err (!%p486_p0)
}
 0x115   : > { %s490_s28 = scalar_lea.hbm %s694_s23, 128  ;;  %s494_s5 = scalar_lea.hbm %s737_s2, 256 }
 0x116   : > { %p491_p5 = scmp.ne.s32.totalorder %s694_s23, %s490_s28  ;;  %p495_p1 = scmp.lt.s32.totalorder %s694_s23, %s737_s2 }
 0x117   : > { %p496_p4 = scmp.lt.s32.totalorder %s494_s5, %s490_s28 }
 0x118   : > { %p492_p9 = pnand %p491_p5, %p753_p3 }
 0x119   : > { %p497_p6 = por %p496_p4, %p495_p1 }
 0x11a   : > { %p493_p12 = pneg %p492_p9 }
 0x11c   : > { %p498_p8 = pnand %p497_p6, %p493_p12 }
 0x11e   : > { %501 = shalt.err (!%p498_p8)
}
 0x11f   : > { %365 = dma.vmem_to_hbm [thread:$0]  (%p753_p3), %s689_s8, 128, %s694_s23, %s238_s24   ;;  %v233_v6 = vpop.f32.mrf.mxu0 }
 0x121   : > { %v358_v7 = vpop.f32.mrf.mxu0 }
 0x122 PF: > { %s263_s14 = sand.u32 1, %s532_s9   ;;  %p754_p11 = scmp.ne.s32.totalorder %s743_s16, 0 }
 0x123   : > { %p755_p7 = scmp.ge.s32.totalorder %s544_s12, 2  ;;  %s264_s22 = scalar_lea.sflag [#allocation4], %s263_s14 }
 0x125   : > { %p376_p10 = pnand %p755_p7, %p754_p11 }
 0x127   : > { %p377_p2 = pneg %p376_p10 }
 0x129   : > { %527 = dma.done.wait (%p377_p2), %s264_s22, 128  }
 0x12a   : > { %529 = vsyncadd (%p377_p2), %s264_s22, 4294967168  ;;  %p16_p3 = scmp.ge.s32.totalorder %s622_s21, 4   ;;  %s756_s9 = smov %s536_s10 }
 0x12b   : > { %s757_s10 = smov %s540_s11  ;;  %s758_s11 = smov %s639_s29 }
 0x12c   : > { %s759_s12 = smov %s622_s21  ;;  %18 = sbr.rel (!%p16_p3) target bundleno = 6 (0x6), region = 77 }
 0x131   :  { %269 = vsyncpa [#allocation3], 1 }
 0x132   :  { %271 = vsyncpa [#allocation3 + $0x1], 1 }
 0x133   :  { %272 = vsyncpa [#allocation6], 1 }
 0x134   :  { %273 = vsyncpa [#allocation4], 1 }
 0x135   :  { %275 = vsyncpa [#allocation4 + $0x1], 1 }

</bundles_post_ra>
